<compile_context>
chip_gen: v7x
topology: tpu7x:2x2x1
jax: 0.10.0
libtpu: 0.0.40
codegen_flags: <defaults>
</compile_context>

<pallas_src>
import numpy as np
import jax
import jax.numpy as jnp
from jax.experimental import pallas as pl
from jax.experimental.pallas import tpu as pltpu


# ----------------------------- Pallas kernel ---------------------------------

def msfrmv_kernel(x_ref, s_ref, xg_ref, w1t_ref, b1_ref, w2t_ref, b2_ref,
                  wcat_ref, bcat_ref, o_ref):
    """Fused channel-major body; one grid step = full batch x one HW tile.

    x_ref    : [B, Cin, T]  feature tile (f32; cast to wcat dtype in-register)
    s_ref    : [Cj, B]      scene-feature columns, f32
    xg_ref   : [B]          SMEM scalars
    w1t_ref  : [Cin, Cj]    scene MLP conv1 (transposed), f32
    b1_ref   : [Cin, 1]     f32
    w2t_ref  : [Cin, Cin]   scene MLP conv2 (transposed), f32
    b2_ref   : [Cin, 1]     f32
    wcat_ref : [2*Cin, Cin] [Wc ; Wp] with eval-mode BN folded, compute dtype
    bcat_ref : [2*Cin, 1]   [bc ; bp], f32
    o_ref    : [B, Cin, T]  refined features (bf16 by default)
    """
    bsz = x_ref.shape[0]
    cin = wcat_ref.shape[1]
    cdt = wcat_ref.dtype

    # Scene MLP recomputed per grid step: a few KFLOPs on an otherwise-idle MXU,
    # cheaper than a second kernel launch + HBM round-trip.
    h = jnp.maximum(
        jnp.dot(w1t_ref[...], s_ref[...], preferred_element_type=jnp.float32)
        + b1_ref[...], 0.0)                                            # [Cin, B]
    scene_t = jnp.dot(w2t_ref[...], h,
                      preferred_element_type=jnp.float32) + b2_ref[...]  # [Cin, B]

    bcat = bcat_ref[...]                                               # [2Cin, 1]

    # Static unroll over the (small) batch keeps everything 2-D lane-dense.
    # TODO(synk): for large B switch to a batch-blocked grid / fori_loop.
    for i in range(bsz):
        x_i = x_ref[i].astype(cdt)                       # in-register cast (no wrapper pass)
        # content_encoders1 + feature_reencoders1 as ONE MXU matmul, f32 accumulate
        y = jnp.dot(wcat_ref[...], x_i,
                    preferred_element_type=jnp.float32) + bcat          # [2Cin, T]
        y = jnp.maximum(y, 0.0)
        content = y[:cin]                                               # [Cin, T]
        p = y[cin:]                                                     # [Cin, T]

        scene_col = scene_t[:, i:i + 1]                                 # [Cin, 1]
        # relations = sigmoid(scene*content) summed over channels (sublane reduce)
        # TODO(synk): if the epilogue ever binds, move the channel sum onto the
        # idle MXU (ones-row matmul) and/or use bf16 VPU math on v6e/v7x.
        relations = jax.nn.sigmoid(scene_col * content).sum(axis=0,
                                                            keepdims=True)  # [1, T]
        xg_i = xg_ref[i]                                                # SMEM scalar
        # (relations * xg) first: scale the [1,T] row before the [Cin,T] multiply.
        o_ref[i] = ((relations * xg_i) * p).astype(o_ref.dtype)


# ------------------------------- wrappers -------------------------------------

def _default_min_steps():
    """>=2 grid steps for dual-TensorCore chips (v7x); 1 on single-TC v5e/v6e."""
    try:
        kind = jax.devices()[0].device_kind.lower()
    except Exception:
        return 2      # safe default: one extra ~0.35us step on single-TC chips
    return 2 if "v7" in kind else 1


def _choose_tile(hw, bytes_per_lane, min_steps, vmem_budget_bytes):
    """Largest lane-dense tile that fits the VMEM budget and yields >= min_steps
    grid steps. tile == hw (full extent) is always layout-legal; partial tiles
    must be multiples of 128 that divide hw (handles non-128-multiple Swin HW)."""
    cap = max(128, (vmem_budget_bytes // max(bytes_per_lane, 1)) // 128 * 128)
    cands = [hw] + [t for t in range(128, hw, 128) if hw % t == 0]
    for t in sorted(cands, reverse=True):
        if t <= cap and hw // t >= min_steps:
            return t
    for t in sorted(cands, reverse=True):        # cannot honor min_steps
        if t <= cap:
            return t                             # TODO(synk): one v7x TC idle here
    return hw                                    # TODO(synk): may exceed v7x VMEM for huge hw


def msfrmv_pallas(x_cm, s_t, xg, w1t, b1c, w2t, b2c, w_cat, b_cat, *,
                  out_dtype=jnp.bfloat16, tile=None, min_steps=None):
    """x_cm: [B, Cin, HW] f32, s_t: [Cj, B] f32, xg: [B] f32 (SMEM),
    w_cat: [2*Cin, Cin] compute dtype, b_cat: [2*Cin, 1] f32."""
    B, Cin, HW = x_cm.shape
    Cj = s_t.shape[0]
    if min_steps is None:
        min_steps = _default_min_steps()

    # Double-buffered x (f32 in) + out (out_dtype) bytes per lane of a tile.
    bytes_per_lane = 2 * B * Cin * (jnp.dtype(x_cm.dtype).itemsize
                                    + jnp.dtype(out_dtype).itemsize)
    if tile is None:
        tile = _choose_tile(HW, bytes_per_lane, min_steps,
                            vmem_budget_bytes=44 << 20)   # headroom under v7x 64 MiB
    assert tile == HW or (tile % 128 == 0 and HW % tile == 0)
    grid = (HW // tile,)

    x_bytes = B * Cin * tile * jnp.dtype(x_cm.dtype).itemsize
    o_bytes = B * Cin * tile * jnp.dtype(out_dtype).itemsize
    vmem_limit = int(min(64 << 20, max(16 << 20, 4 * (x_bytes + o_bytes) + (4 << 20))))

    const = lambda t: (0, 0)
    return pl.pallas_call(
        msfrmv_kernel,
        out_shape=jax.ShapeDtypeStruct((B, Cin, HW), out_dtype),
        grid_spec=pltpu.PrefetchScalarGridSpec(
            num_scalar_prefetch=0,
            grid=grid,
            in_specs=[
                pl.BlockSpec((B, Cin, tile), lambda t: (0, 0, t)),    # x tile
                pl.BlockSpec((Cj, B), const),                         # scene cols
                pl.BlockSpec(memory_space=pltpu.MemorySpace.SMEM),    # xg scalars
                pl.BlockSpec((Cin, Cj), const),                       # w1t
                pl.BlockSpec((Cin, 1), const),                        # b1
                pl.BlockSpec((Cin, Cin), const),                      # w2t
                pl.BlockSpec((Cin, 1), const),                        # b2
                pl.BlockSpec((2 * Cin, Cin), const),                  # [Wc ; Wp]
                pl.BlockSpec((2 * Cin, 1), const),                    # [bc ; bp]
            ],
            out_specs=pl.BlockSpec((B, Cin, tile), lambda t: (0, 0, t)),
        ),
        compiler_params=pltpu.CompilerParams(
            dimension_semantics=("parallel",),
            vmem_limit_bytes=vmem_limit),
    )(x_cm, s_t, xg, w1t, b1c, w2t, b2c, w_cat, b_cat)


def msfrmv_forward(x_cm, s_bc, xg, wc_f, bc_f, wp_f, bp_f, w1, b1, w2, b2, *,
                   compute_dtype=jnp.bfloat16, out_dtype=jnp.bfloat16,
                   tile=None, min_steps=None):
    """Full forward. x_cm: [B, Cin, HW] f32 (pure reshape of NCHW — x itself is
    never cast or transposed in the wrapper), s_bc: [B, Cj]."""
    B, Cin, HW = x_cm.shape
    # Tiny operand prep only (O(Cin^2) / O(B*Cj) elements).
    w_cat = jnp.concatenate([wc_f.T, wp_f.T], axis=0).astype(compute_dtype)   # [2Cin, Cin]
    b_cat = jnp.concatenate([bc_f, bp_f], axis=0).reshape(2 * Cin, 1).astype(jnp.float32)
    s_t = s_bc.T.astype(jnp.float32)                                          # [Cj, B]
    w1t = w1.T.astype(jnp.float32)                                            # [Cin, Cj]
    w2t = w2.T.astype(jnp.float32)                                            # [Cin, Cin]
    b1c = b1.reshape(Cin, 1).astype(jnp.float32)
    b2c = b2.reshape(Cin, 1).astype(jnp.float32)
    return msfrmv_pallas(x_cm, s_t, xg.astype(jnp.float32), w1t, b1c, w2t, b2c,
                         w_cat, b_cat, out_dtype=out_dtype, tile=tile,
                         min_steps=min_steps)


# ------------------------------ parameter glue -------------------------------

def init_conv1x1(key, cin, cout):
    """Deterministic init mimicking PyTorch Conv2d default; weight stored as a
    matmul matrix [cin, cout] (== torch weight[:, :, 0, 0].T)."""
    k1, k2 = jax.random.split(key)
    bound = 1.0 / np.sqrt(cin)
    w = jax.random.uniform(k1, (cin, cout), jnp.float32, -bound, bound)
    b = jax.random.uniform(k2, (cout,), jnp.float32, -bound, bound)
    return w, b


def init_bn(key, c):
    k1, k2 = jax.random.split(key)
    gamma = 1.0 + 0.1 * jax.random.normal(k1, (c,), jnp.float32)
    beta = 0.1 * jax.random.normal(k2, (c,), jnp.float32)
    return gamma, beta


def fold_bn(w, b, gamma, beta, eps=1e-5):
    # eval-mode BN with running_mean=0, running_var=1
    # TODO(synk): fold real running_mean/var here when loading a trained model.
    scale = gamma / jnp.sqrt(1.0 + eps)
    return w * scale[None, :], b * scale + beta


# ------------------------------ references (plain JAX) ------------------------

def conv1x1_nchw(x, w, b):
    # w stored as [cin, cout]
    return jnp.einsum('bihw,io->bohw', x, w) + b[None, :, None, None]


def bn_nchw(x, gamma, beta, eps=1e-5):
    return x / jnp.sqrt(1.0 + eps) * gamma[None, :, None, None] + beta[None, :, None, None]


def msfrmv_reference(scene_nchw, feat_nchw, xg, params):
    """Mirror of the torch forward (unfused BN, NCHW, float32)."""
    (wc, bc, gc, betc), (wp, bp, gp, betp), (w1, b1, w2, b2) = params
    content = jax.nn.relu(bn_nchw(conv1x1_nchw(feat_nchw, wc, bc), gc, betc))
    scene = conv1x1_nchw(jax.nn.relu(conv1x1_nchw(scene_nchw, w1, b1)), w2, b2)
    relations = jax.nn.sigmoid(scene * content).sum(axis=1, keepdims=True)
    p = jax.nn.relu(bn_nchw(conv1x1_nchw(feat_nchw, wp, bp), gp, betp))
    xg = xg.reshape(xg.shape[0], 1, 1, 1)
    return relations * p * xg


def msfrmv_reference_folded(s_bc, x_cm, xg, wc_f, bc_f, wp_f, bp_f, w1, b1, w2, b2):
    """Channel-major reference on already-folded weights (validates the bf16
    path against the same rounded matmul operands the kernel sees; f32 math)."""
    h = jax.nn.relu(s_bc @ w1 + b1)
    scene = (h @ w2 + b2)[:, :, None]                                   # [B, Cin, 1]
    content = jax.nn.relu(jnp.einsum('io,bis->bos', wc_f, x_cm) + bc_f[None, :, None])
    relations = jax.nn.sigmoid(scene * content).sum(axis=1, keepdims=True)
    p = jax.nn.relu(jnp.einsum('io,bis->bos', wp_f, x_cm) + bp_f[None, :, None])
    return relations * p * xg[:, None, None]


# ----------------------------------- main ------------------------------------

if __name__ == "__main__":
    B, Cin, H, W = 2, 32, 16, 16
    channel_list = [32, 64, 128, 256]
    j = 1
    Cj = channel_list[j]

    key = jax.random.PRNGKey(0)
    keys = jax.random.split(key, 10)

    # inputs (PyTorch NCHW convention)
    feature_x_xonv = jax.random.normal(keys[0], (B, Cin, H, W), jnp.float32)
    scene_feature = jax.random.normal(keys[1], (B, Cj, 1, 1), jnp.float32)
    xg = jax.random.uniform(keys[2], (B,), jnp.float32, 0.5, 1.5)

    # parameters (only those used by forward for the chosen j)
    wc, bc = init_conv1x1(keys[3], Cin, Cin)      # content_encoders1 conv
    gc, betc = init_bn(keys[4], Cin)              # content_encoders1 BN
    wp, bp = init_conv1x1(keys[5], Cin, Cin)      # feature_reencoders1 conv
    gp, betp = init_bn(keys[6], Cin)              # feature_reencoders1 BN
    w1, b1 = init_conv1x1(keys[7], Cj, Cin)       # scene_encoder1_list[j] conv1
    w2, b2 = init_conv1x1(keys[8], Cin, Cin)      # scene_encoder1_list[j] conv2

    # fold eval-mode BN into the content / reencoder convs
    wc_f, bc_f = fold_bn(wc, bc, gc, betc)
    wp_f, bp_f = fold_bn(wp, bp, gp, betp)

    # channel-major flatten: NCHW -> [B, C, H*W] (pure reshape, no transpose/cast)
    x_cm = feature_x_xonv.reshape(B, Cin, H * W)
    s_bc = scene_feature.reshape(B, Cj)

    ref_nchw = msfrmv_reference(
        scene_feature, feature_x_xonv, xg,
        ((wc, bc, gc, betc), (wp, bp, gp, betp), (w1, b1, w2, b2)))

    # ---- float32 path vs. the exact torch-forward reference -----------------
    out_f32 = msfrmv_forward(x_cm, s_bc, xg, wc_f, bc_f, wp_f, bp_f,
                             w1, b1, w2, b2,
                             compute_dtype=jnp.float32, out_dtype=jnp.float32)
    out_f32 = jax.block_until_ready(out_f32)
    np.testing.assert_allclose(np.asarray(out_f32.reshape(B, Cin, H, W)),
                               np.asarray(ref_nchw), rtol=1e-3, atol=1e-3)

    # ---- default path: bf16 matmul operands + bf16 output (all generations) -
    out_bf16 = msfrmv_forward(x_cm, s_bc, xg, wc_f, bc_f, wp_f, bp_f,
                              w1, b1, w2, b2)
    out_bf16 = jax.block_until_ready(out_bf16)
    out_bf16_f32 = np.asarray(out_bf16.astype(jnp.float32))
    # bf16-aware reference: same rounded matmul operands, f32 math
    rd = lambda a: a.astype(jnp.bfloat16).astype(jnp.float32)
    ref_bf16 = msfrmv_reference_folded(
        s_bc, rd(x_cm), xg, rd(wc_f), bc_f, rd(wp_f), bp_f, w1, b1, w2, b2)
    np.testing.assert_allclose(out_bf16_f32, np.asarray(ref_bf16),
                               rtol=2e-2, atol=2e-2)
    # loose sanity check against the full-precision reference
    np.testing.assert_allclose(out_bf16_f32.reshape(B, Cin, H, W),
                               np.asarray(ref_nchw), rtol=5e-2, atol=5e-1)

    print("KERNEL_OK")
</pallas_src>

<mosaic_0001>
module attributes {stable_mosaic.version = 11 : i64} {
  func.func @msfrmv_kernel(%arg0: i32, %arg1: memref<2x32x256xf32, #tpu.memory_space<vmem>>, %arg2: memref<64x2xf32, #tpu.memory_space<vmem>>, %arg3: memref<2xf32, #tpu.memory_space<smem>>, %arg4: memref<32x64xf32, #tpu.memory_space<vmem>>, %arg5: memref<32x1xf32, #tpu.memory_space<vmem>>, %arg6: memref<32x32xf32, #tpu.memory_space<vmem>>, %arg7: memref<32x1xf32, #tpu.memory_space<vmem>>, %arg8: memref<64x32xf32, #tpu.memory_space<vmem>>, %arg9: memref<64x1xf32, #tpu.memory_space<vmem>>, %arg10: memref<2x32x256xf32, #tpu.memory_space<vmem>>) attributes {dimension_semantics = [#tpu.dimension_semantics<parallel>], iteration_bounds = array<i64: 1>, scalar_prefetch = 0 : i64, scratch_operands = 0 : i64, tpu.core_type = #tpu.core_type<tc>, window_params = [{transform_indices = @transform_0, window_bounds = array<i64: 2, 32, 256>}, {pipeline_mode = #tpu.pipeline_mode<synchronous>, transform_indices = @transform_1, window_bounds = array<i64: 64, 2>}, {transform_indices = @transform_2, window_bounds = array<i64: 2>}, {pipeline_mode = #tpu.pipeline_mode<synchronous>, transform_indices = @transform_3, window_bounds = array<i64: 32, 64>}, {pipeline_mode = #tpu.pipeline_mode<synchronous>, transform_indices = @transform_4, window_bounds = array<i64: 32, 1>}, {pipeline_mode = #tpu.pipeline_mode<synchronous>, transform_indices = @transform_5, window_bounds = array<i64: 32, 32>}, {pipeline_mode = #tpu.pipeline_mode<synchronous>, transform_indices = @transform_6, window_bounds = array<i64: 32, 1>}, {pipeline_mode = #tpu.pipeline_mode<synchronous>, transform_indices = @transform_7, window_bounds = array<i64: 64, 32>}, {pipeline_mode = #tpu.pipeline_mode<synchronous>, transform_indices = @transform_8, window_bounds = array<i64: 64, 1>}, {transform_indices = @transform_9, window_bounds = array<i64: 2, 32, 256>}]} {
    %c0 = arith.constant 0 : index
    %c0_0 = arith.constant 0 : index
    %0 = vector.load %arg4[%c0, %c0_0] : memref<32x64xf32, #tpu.memory_space<vmem>>, vector<32x64xf32>
    %c0_1 = arith.constant 0 : index
    %c0_2 = arith.constant 0 : index
    %1 = vector.load %arg2[%c0_1, %c0_2] : memref<64x2xf32, #tpu.memory_space<vmem>>, vector<64x2xf32>
    %cst = arith.constant dense<0.000000e+00> : vector<32x2xf32>
    %2 = tpu.matmul %0, %1, %cst {dimension_numbers = #tpu.dot_dimension_numbers<[1], [0], [0], [1], [0, 0, 1, 1], [], []>} : vector<32x64xf32>, vector<64x2xf32>, vector<32x2xf32> -> vector<32x2xf32>
    %c0_3 = arith.constant 0 : index
    %c0_4 = arith.constant 0 : index
    %3 = vector.load %arg5[%c0_3, %c0_4] : memref<32x1xf32, #tpu.memory_space<vmem>>, vector<32x1xf32>
    %4 = vector.broadcast %3 : vector<32x1xf32> to vector<32x2xf32>
    %5 = arith.addf %2, %4 : vector<32x2xf32>
    %cst_5 = arith.constant 0.000000e+00 : f32
    %6 = vector.broadcast %cst_5 : f32 to vector<32x2xf32>
    %7 = arith.maximumf %5, %6 : vector<32x2xf32>
    %c0_6 = arith.constant 0 : index
    %c0_7 = arith.constant 0 : index
    %8 = vector.load %arg6[%c0_6, %c0_7] : memref<32x32xf32, #tpu.memory_space<vmem>>, vector<32x32xf32>
    %cst_8 = arith.constant dense<0.000000e+00> : vector<32x2xf32>
    %9 = tpu.matmul %8, %7, %cst_8 {dimension_numbers = #tpu.dot_dimension_numbers<[1], [0], [0], [1], [0, 0, 1, 1], [], []>} : vector<32x32xf32>, vector<32x2xf32>, vector<32x2xf32> -> vector<32x2xf32>
    %c0_9 = arith.constant 0 : index
    %c0_10 = arith.constant 0 : index
    %10 = vector.load %arg7[%c0_9, %c0_10] : memref<32x1xf32, #tpu.memory_space<vmem>>, vector<32x1xf32>
    %11 = vector.broadcast %10 : vector<32x1xf32> to vector<32x2xf32>
    %12 = arith.addf %9, %11 : vector<32x2xf32>
    %c0_11 = arith.constant 0 : index
    %c0_12 = arith.constant 0 : index
    %13 = vector.load %arg9[%c0_11, %c0_12] : memref<64x1xf32, #tpu.memory_space<vmem>>, vector<64x1xf32>
    %c0_13 = arith.constant 0 : index
    %c0_14 = arith.constant 0 : index
    %c0_15 = arith.constant 0 : index
    %14 = vector.load %arg1[%c0_13, %c0_14, %c0_15] : memref<2x32x256xf32, #tpu.memory_space<vmem>>, vector<1x32x256xf32>
    %15 = vector.shape_cast %14 : vector<1x32x256xf32> to vector<32x256xf32>
    %c0_16 = arith.constant 0 : index
    %c0_17 = arith.constant 0 : index
    %16 = vector.load %arg8[%c0_16, %c0_17] : memref<64x32xf32, #tpu.memory_space<vmem>>, vector<64x32xf32>
    %cst_18 = arith.constant dense<0.000000e+00> : vector<64x256xf32>
    %17 = tpu.matmul %16, %15, %cst_18 {dimension_numbers = #tpu.dot_dimension_numbers<[1], [0], [0], [1], [0, 0, 1, 1], [], []>} : vector<64x32xf32>, vector<32x256xf32>, vector<64x256xf32> -> vector<64x256xf32>
    %18 = vector.broadcast %13 : vector<64x1xf32> to vector<64x256xf32>
    %19 = arith.addf %17, %18 : vector<64x256xf32>
    %cst_19 = arith.constant 0.000000e+00 : f32
    %20 = vector.broadcast %cst_19 : f32 to vector<64x256xf32>
    %21 = arith.maximumf %19, %20 : vector<64x256xf32>
    %22 = vector.extract_strided_slice %21 {offsets = [0, 0], sizes = [32, 256], strides = [1, 1]} : vector<64x256xf32> to vector<32x256xf32>
    %23 = vector.extract_strided_slice %21 {offsets = [32, 0], sizes = [32, 256], strides = [1, 1]} : vector<64x256xf32> to vector<32x256xf32>
    %24 = vector.extract_strided_slice %12 {offsets = [0, 0], sizes = [32, 1], strides = [1, 1]} : vector<32x2xf32> to vector<32x1xf32>
    %25 = vector.broadcast %24 : vector<32x1xf32> to vector<32x256xf32>
    %26 = arith.mulf %25, %22 : vector<32x256xf32>
    %27 = arith.negf %26 : vector<32x256xf32>
    %28 = math.exp %27 : vector<32x256xf32>
    %cst_20 = arith.constant 1.000000e+00 : f32
    %29 = vector.broadcast %cst_20 : f32 to vector<32x256xf32>
    %30 = arith.addf %29, %28 : vector<32x256xf32>
    %31 = arith.divf %29, %30 : vector<32x256xf32>
    %cst_21 = arith.constant dense<0.000000e+00> : vector<256xf32>
    %32 = vector.multi_reduction <add>, %31, %cst_21 [0] : vector<32x256xf32> to vector<256xf32>
    %33 = vector.shape_cast %32 : vector<256xf32> to vector<1x256xf32>
    %c0_22 = arith.constant 0 : index
    %34 = memref.load %arg3[%c0_22] : memref<2xf32, #tpu.memory_space<smem>>
    %35 = vector.broadcast %34 : f32 to vector<1x256xf32>
    %36 = arith.mulf %33, %35 : vector<1x256xf32>
    %37 = vector.broadcast %36 : vector<1x256xf32> to vector<32x256xf32>
    %38 = arith.mulf %37, %23 : vector<32x256xf32>
    %c0_23 = arith.constant 0 : index
    %c0_24 = arith.constant 0 : index
    %c0_25 = arith.constant 0 : index
    %39 = vector.load %arg10[%c0_23, %c0_24, %c0_25] : memref<2x32x256xf32, #tpu.memory_space<vmem>>, vector<1x32x256xf32>
    %40 = vector.shape_cast %39 : vector<1x32x256xf32> to vector<32x256xf32>
    %41 = vector.shape_cast %38 : vector<32x256xf32> to vector<1x32x256xf32>
    tpu.vector_store %arg10[%c0_23, %c0_24, %c0_25], %41 {strides = array<i32>} : memref<2x32x256xf32, #tpu.memory_space<vmem>>, vector<1x32x256xf32>,
    %c1 = arith.constant 1 : index
    %c0_26 = arith.constant 0 : index
    %c0_27 = arith.constant 0 : index
    %42 = vector.load %arg1[%c1, %c0_26, %c0_27] : memref<2x32x256xf32, #tpu.memory_space<vmem>>, vector<1x32x256xf32>
    %43 = vector.shape_cast %42 : vector<1x32x256xf32> to vector<32x256xf32>
    %c0_28 = arith.constant 0 : index
    %c0_29 = arith.constant 0 : index
    %44 = vector.load %arg8[%c0_28, %c0_29] : memref<64x32xf32, #tpu.memory_space<vmem>>, vector<64x32xf32>
    %cst_30 = arith.constant dense<0.000000e+00> : vector<64x256xf32>
    %45 = tpu.matmul %44, %43, %cst_30 {dimension_numbers = #tpu.dot_dimension_numbers<[1], [0], [0], [1], [0, 0, 1, 1], [], []>} : vector<64x32xf32>, vector<32x256xf32>, vector<64x256xf32> -> vector<64x256xf32>
    %46 = vector.broadcast %13 : vector<64x1xf32> to vector<64x256xf32>
    %47 = arith.addf %45, %46 : vector<64x256xf32>
    %cst_31 = arith.constant 0.000000e+00 : f32
    %48 = vector.broadcast %cst_31 : f32 to vector<64x256xf32>
    %49 = arith.maximumf %47, %48 : vector<64x256xf32>
    %50 = vector.extract_strided_slice %49 {offsets = [0, 0], sizes = [32, 256], strides = [1, 1]} : vector<64x256xf32> to vector<32x256xf32>
    %51 = vector.extract_strided_slice %49 {offsets = [32, 0], sizes = [32, 256], strides = [1, 1]} : vector<64x256xf32> to vector<32x256xf32>
    %52 = vector.extract_strided_slice %12 {offsets = [0, 1], sizes = [32, 1], strides = [1, 1]} : vector<32x2xf32> to vector<32x1xf32>
    %53 = vector.broadcast %52 : vector<32x1xf32> to vector<32x256xf32>
    %54 = arith.mulf %53, %50 : vector<32x256xf32>
    %55 = arith.negf %54 : vector<32x256xf32>
    %56 = math.exp %55 : vector<32x256xf32>
    %cst_32 = arith.constant 1.000000e+00 : f32
    %57 = vector.broadcast %cst_32 : f32 to vector<32x256xf32>
    %58 = arith.addf %57, %56 : vector<32x256xf32>
    %59 = arith.divf %57, %58 : vector<32x256xf32>
    %cst_33 = arith.constant dense<0.000000e+00> : vector<256xf32>
    %60 = vector.multi_reduction <add>, %59, %cst_33 [0] : vector<32x256xf32> to vector<256xf32>
    %61 = vector.shape_cast %60 : vector<256xf32> to vector<1x256xf32>
    %c1_34 = arith.constant 1 : index
    %62 = memref.load %arg3[%c1_34] : memref<2xf32, #tpu.memory_space<smem>>
    %63 = vector.broadcast %62 : f32 to vector<1x256xf32>
    %64 = arith.mulf %61, %63 : vector<1x256xf32>
    %65 = vector.broadcast %64 : vector<1x256xf32> to vector<32x256xf32>
    %66 = arith.mulf %65, %51 : vector<32x256xf32>
    %c1_35 = arith.constant 1 : index
    %c0_36 = arith.constant 0 : index
    %c0_37 = arith.constant 0 : index
    %67 = vector.load %arg10[%c1_35, %c0_36, %c0_37] : memref<2x32x256xf32, #tpu.memory_space<vmem>>, vector<1x32x256xf32>
    %68 = vector.shape_cast %67 : vector<1x32x256xf32> to vector<32x256xf32>
    %69 = vector.shape_cast %66 : vector<32x256xf32> to vector<1x32x256xf32>
    tpu.vector_store %arg10[%c1_35, %c0_36, %c0_37], %69 {strides = array<i32>} : memref<2x32x256xf32, #tpu.memory_space<vmem>>, vector<1x32x256xf32>,
    return
  }
  func.func @transform_0(%arg0: i32) -> (i32, i32, i32) {
    %c0_i32 = arith.constant 0 : i32
    %c0_i32_0 = arith.constant 0 : i32
    %c0_i32_1 = arith.constant 0 : i32
    return %c0_i32, %c0_i32_0, %arg0 : i32, i32, i32
  }
  func.func @transform_1(%arg0: i32) -> (i32, i32) {
    %c0_i32 = arith.constant 0 : i32
    %c0_i32_0 = arith.constant 0 : i32
    %c0_i32_1 = arith.constant 0 : i32
    return %c0_i32, %c0_i32_0 : i32, i32
  }
  func.func @transform_2(%arg0: i32) -> i32 {
    %c0_i32 = arith.constant 0 : i32
    %c0_i32_0 = arith.constant 0 : i32
    return %c0_i32 : i32
  }
  func.func @transform_3(%arg0: i32) -> (i32, i32) {
    %c0_i32 = arith.constant 0 : i32
    %c0_i32_0 = arith.constant 0 : i32
    %c0_i32_1 = arith.constant 0 : i32
    return %c0_i32, %c0_i32_0 : i32, i32
  }
  func.func @transform_4(%arg0: i32) -> (i32, i32) {
    %c0_i32 = arith.constant 0 : i32
    %c0_i32_0 = arith.constant 0 : i32
    %c0_i32_1 = arith.constant 0 : i32
    return %c0_i32, %c0_i32_0 : i32, i32
  }
  func.func @transform_5(%arg0: i32) -> (i32, i32) {
    %c0_i32 = arith.constant 0 : i32
    %c0_i32_0 = arith.constant 0 : i32
    %c0_i32_1 = arith.constant 0 : i32
    return %c0_i32, %c0_i32_0 : i32, i32
  }
  func.func @transform_6(%arg0: i32) -> (i32, i32) {
    %c0_i32 = arith.constant 0 : i32
    %c0_i32_0 = arith.constant 0 : i32
    %c0_i32_1 = arith.constant 0 : i32
    return %c0_i32, %c0_i32_0 : i32, i32
  }
  func.func @transform_7(%arg0: i32) -> (i32, i32) {
    %c0_i32 = arith.constant 0 : i32
    %c0_i32_0 = arith.constant 0 : i32
    %c0_i32_1 = arith.constant 0 : i32
    return %c0_i32, %c0_i32_0 : i32, i32
  }
  func.func @transform_8(%arg0: i32) -> (i32, i32) {
    %c0_i32 = arith.constant 0 : i32
    %c0_i32_0 = arith.constant 0 : i32
    %c0_i32_1 = arith.constant 0 : i32
    return %c0_i32, %c0_i32_0 : i32, i32
  }
  func.func @transform_9(%arg0: i32) -> (i32, i32, i32) {
    %c0_i32 = arith.constant 0 : i32
    %c0_i32_0 = arith.constant 0 : i32
    %c0_i32_1 = arith.constant 0 : i32
    return %c0_i32, %c0_i32_0, %arg0 : i32, i32, i32
  }
}

</mosaic_0001>

<bundles_post_ra>
// kernel: tpu_custom_call.1
= control target key start
LH: loop header
LB: loop body
LE: loop exit
PB: predicated region body
PF: predicated region fallthrough
CT: control target
= control target key end

     0   :  { %14 = vsyncpa [#allocation4], 0  ;;  %s1644_s0 = inlined_call_operand.vmem [shape: f32[2,32,256], index: 0, kind: input, shape index: {}]   ;;  %s1645_s1 = inlined_call_operand.vmem [shape: f32[64,2], index: 1, kind: input, shape index: {}]   ;;  %s1646_s2 = inlined_call_operand.vmem [shape: f32[2], index: 2, kind: input, shape index: {}]   ;;  %s1647_s3 = inlined_call_operand.vmem [shape: f32[32,64], index: 3, kind: input, shape index: {}]   ;;  %s1648_s4 = inlined_call_operand.vmem [shape: f32[32,1], index: 4, kind: input, shape index: {}]   ;;  %s1649_s5 = inlined_call_operand.vmem [shape: f32[32,32], index: 5, kind: input, shape index: {}]   ;;  %s1650_s6 = inlined_call_operand.vmem [shape: f32[32,1], index: 6, kind: input, shape index: {}]   ;;  %s1651_s7 = inlined_call_operand.vmem [shape: f32[64,32], index: 7, kind: input, shape index: {}]   ;;  %s1652_s8 = inlined_call_operand.vmem [shape: f32[64,1], index: 8, kind: input, shape index: {}]   ;;  %s1653_s9 = inlined_call_operand.hbm [shape: f32[2,32,256], index: 9, kind: output, shape index: {}]  }
   0x1   :  { %15 = vsyncpa [#allocation3], 0  ;;  %s26_s11 = sshll.u32 %s1646_s2, 4  ;;  %s27_s11 = int_to_ptr.vmem [resolvable:$true] %s26_s11 }
   0x2   :  { %s1166_s12 = scalar_lea.vmem %s27_s11, 16  ;;  %p1171_p1 = scmp.lt.s32.totalorder %s27_s11, %s27_s11 }
   0x3   :  { %p1167_p0 = scmp.ne.s32.totalorder %s27_s11, %s1166_s12  ;;  %p1172_p2 = scmp.lt.s32.totalorder %s1166_s12, %s1166_s12 }
   0x5   :  { %p1173_p3 = por %p1172_p2, %p1171_p1 }
   0x7   :  { %p1174_p4 = pnand %p1173_p3, %p1167_p0 }
   0x9   :  { %1177 = shalt.err (!%p1174_p4)
}
   0xa   :  { %s1204_s13 = smov [#allocation2]  }
   0xb   :  { %29 = dma.vmem_to_smem %s27_s11, 16, %s1204_s13, [#allocation4]  }
   0xc   :  { %1200 = dma.done.wait [#allocation4], 16  }
   0xd   :  { %1201 = vsyncadd [#allocation4], 4294967280 }
   0xe   :  { %45 = sfence }
   0xf   :  { %v50_v0 = vld [vmem:[%s1645_s1] sm:$0xff]  ;;  %v51_v1 = vld [vmem:[%s1645_s1 + $0x8] sm:$0xff]  ;;  %v52_v2 = vld [vmem:[%s1645_s1 + $0x10] sm:$0xff]  ;;  %vm82_vm0 = vcmask 523264   ;;  %v1205_v9 = vmov 0   ;;  %v1206_v39 = vmov 0.0  }
  0x10   :  { %v1044_v3 = vpack.c.bf16 %v51_v1, %v50_v0  ;;  %v53_v4 = vld [vmem:[%s1645_s1 + $0x18] sm:$0xff]  ;;  %v54_v6 = vld [vmem:[%s1645_s1 + $0x20] sm:$0xff]  ;;  %v55_v7 = vld [vmem:[%s1645_s1 + $0x28] sm:$0xff]  ;;  %1095 = vset.pattern.permute.xlu0 %v1205_v9  ;;  %1096 = vset.pattern.permute.xlu1 %v1205_v9  ;;  %vm212_vm1 = vcmask 261120   ;;  %s1596_s23 = sld [smem:[#allocation2 + $0x1]] }
  0x11   :  { %v1048_v5 = vpack.c.bf16 %v53_v4, %v52_v2  ;;  %v46_v8 = vld [vmem:[%s1647_s3] sm:$0xff]  ;;  %v1052_v10 = vpack.c.bf16 %v55_v7, %v54_v6  ;;  %v56_v11 = vld [vmem:[%s1645_s1 + $0x30] sm:$0xff]  ;;  %v57_v12 = vld [vmem:[%s1645_s1 + $0x38] sm:$0xff] }
  0x12   :  { %1045 = vmatprep.subr.bf16.mxu0 %v1044_v3  ;;  %1024 = vmatprep.mubr.msk.f32.mxu0 %vm82_vm0, %v46_v8  ;;  %v58_v13 = vld [vmem:[%s1648_s4] sm:$0xff]  ;;  %v60_v14 = vld [vmem:[%s1648_s4 + $0x10] sm:$0xff]  ;;  %v1056_v15 = vpack.c.bf16 %v57_v12, %v56_v11  ;;  %v964_v16 = vld [vmem:[%s1644_s0 + $0x48] sm:$0xff] }
  0x13   :  { %1047 = vmatpush3.bf16.msra.mxu0 %v1044_v3  ;;  %64 = vperm.xlu0 %1095, %v58_v13   ;;  %v966_v17 = vld [vmem:[%s1644_s0 + $0x58] sm:$0xff]  ;;  %v59_v18 = vld [vmem:[%s1648_s4 + $0x8] sm:$0xff]  ;;  %v963_v21 = vld [vmem:[%s1644_s0 + $0x40] sm:$0xff] }
  0x14   :  { %1049 = vmatprep.subr.bf16.mxu0 %v1048_v5  ;;  %74 = vperm.xlu1 %1096, %v60_v14   ;;  %v61_v19 = vld [vmem:[%s1648_s4 + $0x18] sm:$0xff]  ;;  %v1312_v20 = vpack.c.bf16 %v966_v17, %v964_v16  ;;  %v965_v22 = vld [vmem:[%s1644_s0 + $0x50] sm:$0xff]  ;;  %v968_v23 = vld [vmem:[%s1644_s0 + $0x68] sm:$0xff] }
  0x15   :  { %v970_v24 = vld [vmem:[%s1644_s0 + $0x78] sm:$0xff]  ;;  %v188_v25 = vld [vmem:[%s1650_s6] sm:$0xff]  ;;  %v189_v26 = vld [vmem:[%s1650_s6 + $0x8] sm:$0xff]  ;;  %v1335_v28 = vpack.c.bf16 %v965_v22, %v963_v21 }
  0x16   :  { %v47_v27 = vld [vmem:[%s1647_s3 + $0x8] sm:$0xff]  ;;  %v48_v29 = vld [vmem:[%s1647_s3 + $0x10] sm:$0xff]  ;;  %v1341_v30 = vpack.c.bf16 %v970_v24, %v968_v23  ;;  %v967_v31 = vld [vmem:[%s1644_s0 + $0x60] sm:$0xff] }
  0x17   :  { %1051 = vmatpush3.bf16.msra.mxu0 %v1048_v5  ;;  %69 = vperm.xlu0 %1095, %v59_v18   ;;  %v969_v32 = vld [vmem:[%s1644_s0 + $0x70] sm:$0xff]  ;;  %v191_v34 = vld [vmem:[%s1650_s6 + $0x18] sm:$0xff]  ;;  %v310_v37 = vld [vmem:[%s1652_s8] sm:$0xff] }
  0x18   :  { %1053 = vmatprep.subr.bf16.mxu0 %v1052_v10  ;;  %79 = vperm.xlu1 %1096, %v61_v19   ;;  %v190_v33 = vld [vmem:[%s1650_s6 + $0x10] sm:$0xff]  ;;  %v49_v35 = vld [vmem:[%s1647_s3 + $0x18] sm:$0xff]  ;;  %v1361_v36 = vpack.c.bf16 %v969_v32, %v967_v31  ;;  %v311_v38 = vld [vmem:[%s1652_s8 + $0x8] sm:$0xff]  ;;  %s1208_s6 = smov [#allocation5]  }
  0x19   :  { %v1376_v40 = vld [vmem:[%s1651_s7] sm:$0xff]  ;;  %v312_v41 = vld [vmem:[%s1652_s8 + $0x10] sm:$0xff]  ;;  %v313_v42 = vld [vmem:[%s1652_s8 + $0x18] sm:$0xff]  ;;  %s927_s24 = sshll.u32 %s1208_s6, 4  ;;  %s928_s24 = int_to_ptr.vmem [resolvable:$true] %s927_s24 }
  0x1a   :  { %v1390_v43 = vld [vmem:[%s1651_s7 + $0x8] sm:$0xff]  ;;  %v1398_v44 = vld [vmem:[%s1651_s7 + $0x10] sm:$0xff]  ;;  %v1406_v45 = vld [vmem:[%s1651_s7 + $0x18] sm:$0xff]  ;;  %s1178_s3 = scalar_lea.vmem %s928_s24, 2048  ;;  %p1183_p6 = scmp.lt.s32.totalorder %s928_s24, %s928_s24 }
  0x1b   :  { %1055 = vmatpush3.bf16.msra.mxu0 %v1052_v10  ;;  %194 = vperm.xlu0 %1095, %v188_v25   ;;  %v184_v46 = vld [vmem:[%s1649_s5] sm:$0xff]  ;;  %v1426_v48 = vld [vmem:[%s1651_s7 + $0x28] sm:$0xff]  ;;  %v1434_v49 = vld [vmem:[%s1651_s7 + $0x30] sm:$0xff]  ;;  %p1179_p5 = scmp.ne.s32.totalorder %s928_s24, %s1178_s3  ;;  %p1184_p7 = scmp.lt.s32.totalorder %s1178_s3, %s1178_s3 }
  0x1c   :  { %1057 = vmatprep.subr.bf16.mxu0 %v1056_v15  ;;  %199 = vperm.xlu1 %1096, %v189_v26   ;;  %v1418_v47 = vld [vmem:[%s1651_s7 + $0x20] sm:$0xff]  ;;  %v319_v2 = vld [vmem:[%s1644_s0 + $0x8] sm:$0xff]  ;;  %v321_v3 = vld [vmem:[%s1644_s0 + $0x18] sm:$0xff] }
  0x1d   :  { %1038 = vmatprep.mubr.msk.f32.mxu1 %vm212_vm1, %v184_v46  ;;  %v1068_v8 = vpack.c.bf16 %v321_v3, %v319_v2  ;;  %v318_v10 = vld [vmem:[%s1644_s0] sm:$0xff]  ;;  %v320_v11 = vld [vmem:[%s1644_s0 + $0x10] sm:$0xff]  ;;  %v323_v12 = vld [vmem:[%s1644_s0 + $0x28] sm:$0xff]  ;;  %p1185_p8 = por %p1184_p7, %p1183_p6 }
  0x1e   :  { %v325_v13 = vld [vmem:[%s1644_s0 + $0x38] sm:$0xff]  ;;  %v185_v16 = vld [vmem:[%s1649_s5 + $0x8] sm:$0xff]  ;;  %v1070_v17 = vpack.c.bf16 %v320_v11, %v318_v10  ;;  %v186_v18 = vld [vmem:[%s1649_s5 + $0x10] sm:$0xff] }
  0x1f   :  { %1059 = vmatpush3.bf16.msra.mxu0 %v1056_v15  ;;  %204 = vperm.xlu0 %1095, %v190_v33   ;;  %v1072_v19 = vpack.c.bf16 %v325_v13, %v323_v12  ;;  %v322_v21 = vld [vmem:[%s1644_s0 + $0x20] sm:$0xff]  ;;  %v324_v22 = vld [vmem:[%s1644_s0 + $0x30] sm:$0xff]  ;;  %v187_v25 = vld [vmem:[%s1649_s5 + $0x18] sm:$0xff]  ;;  %p1186_p9 = pnand %p1185_p8, %p1179_p5 }
  0x20   :  { %1077 = vmatprep.subr.bf16.mxu0 %v1312_v20  ;;  %209 = vperm.xlu1 %1096, %v191_v34   ;;  %v1074_v26 = vpack.c.bf16 %v324_v22, %v322_v21 }
  0x22   :  { %1025 = vmatmul.mubr.msk.f32.vlgmr.msra.gmra.mrb[0].mxu0 %vm82_vm0, %v47_v27 }
  0x23   :  { %1079 = vmatpush1.bf16.msra.mxu0 %v1335_v28  ;;  %1027 = vmatprep.mubr.msk.f32.mxu0 %vm82_vm0, %v48_v29 }
  0x24   :  { %1081 = vmatprep.subr.bf16.mxu0 %v1341_v30  ;;  %336 = vperm.xlu0 %1095, %v310_v37   ;;  %v1207_v37 = vmov 1  }
  0x25   :  { %341 = vperm.xlu1 %1096, %v311_v38  }
  0x26   :  { %1028 = vmatmul.mubr.msk.f32.gmra.mrb[2].mxu0 %vm82_vm0, %v49_v35 }
  0x27   :  { %1083 = vmatpush1.bf16.msra.mxu0 %v1361_v36  ;;  %746 = vmatprep.mubr.f32.mxu0 %v1206_v39 }
  0x28   :  { %346 = vperm.xlu0 %1095, %v312_v41  }
  0x29   :  { %351 = vperm.xlu1 %1096, %v313_v42  }
  0x2a   :  { %971 = vmatmul.mubr.msk.f32.vlgmr.msra.gmra.mrb[4].mxu0 %vm212_vm1, %v1376_v40 }
  0x2b   :  { %752 = vmatprep.mubr.f32.mxu0 %v1206_v39 }
  0x2e   :  { %972 = vmatmul.mubr.msk.f32.gmra.mrb[6].mxu0 %vm212_vm1, %v1390_v43 }
  0x2f   :  { %758 = vmatprep.mubr.f32.mxu0 %v1206_v39 }
  0x32   :  { %973 = vmatmul.mubr.msk.f32.gmra.mrb[8].mxu0 %vm212_vm1, %v1398_v44 }
  0x33   :  { %764 = vmatprep.mubr.f32.mxu0 %v1206_v39 }
  0x36   :  { %974 = vmatmul.mubr.msk.f32.gmra.mrb[10].mxu0 %vm212_vm1, %v1406_v45 }
  0x37   :  { %770 = vmatprep.mubr.f32.mxu0 %v1206_v39 }
  0x3a   :  { %975 = vmatmul.mubr.msk.f32.gmra.mrb[12].mxu0 %vm212_vm1, %v1418_v47 }
  0x3b   :  { %776 = vmatprep.mubr.f32.mxu0 %v1206_v39 }
  0x3e   :  { %976 = vmatmul.mubr.msk.f32.gmra.mrb[14].mxu0 %vm212_vm1, %v1426_v48 }
  0x3f   :  { %782 = vmatprep.mubr.f32.mxu0 %v1206_v39 }
  0x42   :  { %977 = vmatmul.mubr.msk.f32.gmra.mrb[16].mxu0 %vm212_vm1, %v1434_v49 }
  0x92   :  { %v65_v50 = vpop.permute.xlu0 %64 }
  0x93   :  { %v75_v51 = vpop.permute.xlu1 %74 }
  0x96   :  { %v70_v52 = vpop.permute.xlu0 %69 }
  0x97   :  { %v80_v58 = vpop.permute.xlu1 %79 }
  0x9a   :  { %v195_v31 = vpop.permute.xlu0 %194 }
  0xf5   :  { %v1026_v53 = vpop.f32.mrb[0].mxu0 }
  0xf6   :  { %v167_v54 = vadd.f32 %v1026_v53, %v70_v52  ;;  %v161_v55 = vpop.f32.mrb[1].mxu0  ;;  %v316_v52 = vld [vmem:[%s1652_s8 + $0x30] sm:$0xff]  ;;  %v317_v53 = vld [vmem:[%s1652_s8 + $0x38] sm:$0xff] }
  0xf7   :  { %v162_v56 = vadd.f32 %v161_v55, %v65_v50 }
  0xf8   :  { %v181_v57 = vmax.f32 %v167_v54, 0.0 }
  0xf9   :  { %v180_v59 = vmax.f32 %v162_v56, 0.0  ;;  %v1029_v60 = vpop.f32.mrb[2].mxu0 }
  0xfa   :  { %v177_v61 = vadd.f32 %v1029_v60, %v80_v58  ;;  %v171_v62 = vpop.f32.mrb[3].mxu0 }
  0xfb   :  { %v172_v63 = vadd.f32 %v171_v62, %v75_v51  ;;  %v1060_v0 = vpack.c.bf16 %v181_v57, %v180_v59 }
  0xfc   :  { %v183_v1 = vmax.f32 %v177_v61, 0.0 }
  0xfd   :  { %v182_v4 = vmax.f32 %v172_v63, 0.0  ;;  %1061 = vmatprep.subr.bf16.mxu1 %v1060_v0  ;;  %v1444_v5 = vpop.f32.mrb[4].mxu0 }
  0xfe   :  { %1063 = vmatpush3.bf16.msra.mxu1 %v1060_v0  ;;  %v1446_v6 = vpop.f32.mrb[5].mxu0 }
  0xff   :  { %v1064_v7 = vpack.c.bf16 %v183_v1, %v182_v4 }
 0x101   :  { %1065 = vmatprep.subr.bf16.mxu1 %v1064_v7  ;;  %v1460_v14 = vpop.f32.mrb[6].mxu0 }
 0x102   :  { %1067 = vmatpush3.bf16.msra.mxu1 %v1064_v7  ;;  %v1462_v15 = vpop.f32.mrb[7].mxu0 }
 0x103   :  { %1069 = vmatprep.subr.bf16.mxu1 %v1068_v8 }
 0x105   :  { %1039 = vmatmul.mubr.msk.f32.vlgmr.msra.gmra.mrb[0].mxu1 %vm212_vm1, %v185_v16  ;;  %v1477_v23 = vpop.f32.mrb[8].mxu0 }
 0x106   :  { %1071 = vmatpush1.bf16.msra.mxu1 %v1070_v17  ;;  %v1479_v24 = vpop.f32.mrb[9].mxu0  ;;  %1041 = vmatprep.mubr.msk.f32.mxu1 %vm212_vm1, %v186_v18 }
 0x107   :  { %1073 = vmatprep.subr.bf16.mxu1 %v1072_v19 }
 0x109   :  { %1042 = vmatmul.mubr.msk.f32.gmra.mrb[2].mxu1 %vm212_vm1, %v187_v25  ;;  %v1486_v27 = vpop.f32.mrb[10].mxu0 }
 0x10a   :  { %1075 = vmatpush1.bf16.msra.mxu1 %v1074_v26  ;;  %v1488_v29 = vpop.f32.mrb[11].mxu0  ;;  %462 = vmatprep.mubr.f32.mxu1 %v1206_v39 }
 0x10b   :  { %1084 = vmatprep.subr.bf16.mxu1 %v1312_v20  ;;  %v333_v20 = vld [vmem:[%s1651_s7 + $0x38] sm:$0xff] }
 0x10d   :  { %947 = vmatmul.mubr.msk.f32.vlgmr.msra.gmra.mrb[4].mxu1 %vm212_vm1, %v1376_v40  ;;  %v1546_v55 = vpop.f32.mrb[12].mxu0 }
 0x10e   :  { %468 = vmatprep.mubr.f32.mxu1 %v1206_v39  ;;  %1086 = vmatpush1.bf16.msra.mxu1 %v1335_v28  ;;  %v200_v28 = vpop.permute.xlu1 %199  ;;  %v1550_v57 = vpop.f32.mrb[13].mxu0 }
 0x10f   :  { %1085 = vmatprep.subr.bf16.mxu1 %v1341_v30 }
 0x111   :  { %948 = vmatmul.mubr.msk.f32.gmra.mrb[6].mxu1 %vm212_vm1, %v1390_v43  ;;  %v1554_v58 = vpop.f32.mrb[14].mxu0 }
 0x112   :  { %474 = vmatprep.mubr.f32.mxu1 %v1206_v39  ;;  %1087 = vmatpush1.bf16.msra.mxu1 %v1361_v36  ;;  %v1558_v60 = vpop.f32.mrb[15].mxu0 }
 0x115   :  { %949 = vmatmul.mubr.msk.f32.gmra.mrb[8].mxu1 %vm212_vm1, %v1398_v44  ;;  %v210_v44 = vpop.permute.xlu1 %209  ;;  %v1562_v62 = vpop.f32.mrb[16].mxu0 }
 0x116   :  { %480 = vmatprep.mubr.f32.mxu1 %v1206_v39  ;;  %v1566_v0 = vpop.f32.mrb[17].mxu0 }
 0x119   :  { %950 = vmatmul.mubr.msk.f32.gmra.mrb[10].mxu1 %vm212_vm1, %v1406_v45  ;;  %v342_v7 = vpop.permute.xlu1 %341 }
 0x11a   :  { %486 = vmatprep.mubr.f32.mxu1 %v1206_v39  ;;  %v755_v19 = vadd.f32 %v1460_v14, %v342_v7  ;;  %v757_v25 = vadd.f32 %v1462_v15, %v342_v7 }
 0x11d   :  { %951 = vmatmul.mubr.msk.f32.gmra.mrb[12].mxu1 %vm212_vm1, %v1418_v47  ;;  %v1576_v12 = vpop.permute.xlu1 %351 }
 0x11e   :  { %492 = vmatprep.mubr.f32.mxu1 %v1206_v39 }
 0x121   :  { %952 = vmatmul.mubr.msk.f32.gmra.mrb[14].mxu1 %vm212_vm1, %v1426_v48  ;;  %v314_v48 = vld [vmem:[%s1652_s8 + $0x20] sm:$0xff] }
 0x122   :  { %498 = vmatprep.mubr.f32.mxu1 %v1206_v39 }
 0x125   :  { %953 = vmatmul.mubr.msk.f32.gmra.mrb[16].mxu1 %vm212_vm1, %v1434_v49  ;;  %v315_v49 = vld [vmem:[%s1652_s8 + $0x28] sm:$0xff]  ;;  %s1594_s8 = sld [smem:[#allocation2]] }
 0x126   :  { %504 = vmatprep.mubr.f32.mxu1 %v1206_v39 }
 0x129   :  { %954 = vmatmul.mubr.msk.f32.gmra.mrb[18].mxu1 %vm212_vm1, %v333_v20 }
 0x12a   :  { %788 = vmatprep.mubr.f32.mxu1 %v1206_v39  ;;  %v205_v39 = vpop.permute.xlu0 %204 }
 0x12d   :  { %978 = vmatmul.mubr.msk.f32.vlgmr.msra.gmra.mrb[20].mxu1 %vm212_vm1, %v333_v20 }
 0x12e   :  { %v337_v8 = vpop.permute.xlu0 %336 }
 0x12f   :  { %v749_v18 = vadd.f32 %v1444_v5, %v337_v8 }
 0x132   :  { %v347_v17 = vpop.permute.xlu0 %346 }
 0x133   :  { %v761_v14 = vadd.f32 %v1477_v23, %v347_v17 }
 0x1d8   :  { %v1040_v30 = vpop.f32.mrb[0].mxu1 }
 0x1d9   :  { %v297_v32 = vadd.f32 %v1040_v30, %v200_v28  ;;  %v291_v33 = vpop.f32.mrb[1].mxu1  ;;  %v751_v30 = vadd.f32 %v1446_v6, %v337_v8 }
 0x1da   :  { %v292_v34 = vadd.f32 %v291_v33, %v195_v31 }
 0x1db   :  { %534 = vperm.xlu1 %1096, %v297_v32   ;;  %v796_v15 = vmax.f32 %v751_v30, 0.0 }
 0x1dc   :  { %v1043_v35 = vpop.f32.mrb[2].mxu1  ;;  %529 = vperm.xlu0 %1095, %v292_v34  }
 0x1dd   :  { %v301_v36 = vpop.f32.mrb[3].mxu1  ;;  %v307_v45 = vadd.f32 %v1043_v35, %v210_v44 }
 0x1de   :  { %v302_v41 = vadd.f32 %v301_v36, %v205_v39  ;;  %v795_v36 = vmax.f32 %v749_v18, 0.0 }
 0x1df   :  { %1097 = vset.pattern.permute.xlu1 %v1207_v37 }
 0x1e0   :  { %816 = vperm.xlu1 %1097, %v297_v32   ;;  %v464_v38 = vpop.f32.mrb[4].mxu1  ;;  %1098 = vset.pattern.permute.xlu0 %v1207_v37 }
 0x1e1   :  { %v466_v40 = vpop.f32.mrb[5].mxu1  ;;  %812 = vperm.xlu0 %1098, %v292_v34   ;;  %v465_v13 = vadd.f32 %v464_v38, %v337_v8 }
 0x1e2   :  { %v467_v16 = vadd.f32 %v466_v40, %v337_v8  ;;  %v798_v40 = vmax.f32 %v757_v25, 0.0 }
 0x1e3   :  { %v511_v26 = vmax.f32 %v465_v13, 0.0 }
 0x1e4   :  { %1099 = vset.pattern.permute.xlu1 %v1205_v9  ;;  %v470_v42 = vpop.f32.mrb[6].mxu1  ;;  %v512_v20 = vmax.f32 %v467_v16, 0.0 }
 0x1e5   :  { %v472_v43 = vpop.f32.mrb[7].mxu1  ;;  %539 = vperm.xlu1 %1099, %v302_v41   ;;  %820 = vperm.xlu0 %1098, %v302_v41   ;;  %v471_v10 = vadd.f32 %v470_v42, %v342_v7 }
 0x1e6   :  { %v473_v11 = vadd.f32 %v472_v43, %v342_v7  ;;  %v799_v7 = vmax.f32 %v761_v14, 0.0 }
 0x1e7   :  { %v513_v21 = vmax.f32 %v471_v10, 0.0 }
 0x1e8   :  { %v1523_v46 = vpop.f32.mrb[8].mxu1  ;;  %v514_v22 = vmax.f32 %v473_v11, 0.0 }
 0x1e9   :  { %v1525_v47 = vpop.f32.mrb[9].mxu1  ;;  %544 = vperm.xlu1 %1099, %v307_v45   ;;  %824 = vperm.xlu0 %1098, %v307_v45   ;;  %v477_v42 = vadd.f32 %v1523_v46, %v347_v17 }
 0x1ea   :  { %v479_v43 = vadd.f32 %v1525_v47, %v347_v17 }
 0x1eb   :  { %v515_v10 = vmax.f32 %v477_v42, 0.0 }
 0x1ec   :  { %v1533_v50 = vpop.f32.mrb[10].mxu1  ;;  %v516_v11 = vmax.f32 %v479_v43, 0.0 }
 0x1ed   :  { %v1535_v51 = vpop.f32.mrb[11].mxu1  ;;  %356 = vperm.xlu1 %1099, %v314_v48   ;;  %1100 = vset.pattern.permute.xlu0 %v1205_v9 }
 0x1ee   :  { %361 = vperm.xlu0 %1100, %v315_v49   ;;  %v763_v49 = vadd.f32 %v1479_v24, %v347_v17  ;;  %v483_v24 = vadd.f32 %v1533_v50, %v1576_v12  ;;  %v485_v50 = vadd.f32 %v1535_v51, %v1576_v12 }
 0x1f0   :  { %v1544_v54 = vpop.f32.mrb[12].mxu1 }
 0x1f1   :  { %366 = vperm.xlu1 %1099, %v316_v52   ;;  %v1548_v56 = vpop.f32.mrb[13].mxu1 }
 0x1f2   :  { %1101 = vset.pattern.permute.xlu0 %v1207_v37  ;;  %v797_v37 = vmax.f32 %v755_v19, 0.0 }
 0x1f4   :  { %v1552_v9 = vpop.f32.mrb[14].mxu1 }
 0x1f5   :  { %371 = vperm.xlu1 %1099, %v317_v53   ;;  %v1556_v59 = vpop.f32.mrb[15].mxu1 }
 0x1f8   :  { %v1560_v61 = vpop.f32.mrb[16].mxu1 }
 0x1f9   :  { %v1564_v63 = vpop.f32.mrb[17].mxu1 }
 0x1fc   :  { %v1568_v1 = vpop.f32.mrb[18].mxu1 }
 0x1fd   :  { %v1570_v2 = vpop.f32.mrb[19].mxu1 }
 0x200   :  { %v1572_v3 = vpop.f32.mrb[20].mxu1 }
 0x201   :  { %v1574_v4 = vpop.f32.mrb[21].mxu1 }
 0x25a   :  { %v535_v28 = vpop.permute.xlu1 %534 }
 0x25b   :  { %v549_v31 = vmul.f32 %v535_v28, %v513_v21  ;;  %v550_v32 = vmul.f32 %v535_v28, %v514_v22  ;;  %v530_v33 = vpop.permute.xlu0 %529  ;;  %v800_v22 = vmax.f32 %v763_v49, 0.0 }
 0x25c   :  { %v547_v34 = vmul.f32 %v530_v33, %v511_v26  ;;  %v548_v35 = vmul.f32 %v530_v33, %v512_v20 }
 0x25d   :  { %v957_v38 = vmul.f32 -1.442695, %v549_v31  ;;  %v958_v5 = vmul.f32 -1.442695, %v550_v32  ;;  %v767_v31 = vadd.f32 %v1486_v27, %v1576_v12 }
 0x25e   :  { %v955_v39 = vmul.f32 -1.442695, %v547_v34  ;;  %v956_v41 = vmul.f32 -1.442695, %v548_v35  ;;  %v517_v35 = vmax.f32 %v483_v24, 0.0 }
 0x25f   :  { %1102 = vpow2.f32 %v957_v38  ;;  %v817_v6 = vpop.permute.xlu1 %816  ;;  %v769_v38 = vadd.f32 %v1488_v29, %v1576_v12 }
 0x260   :  { %1104 = vpow2.f32 %v958_v5  ;;  %v829_v44 = vmul.f32 %v817_v6, %v797_v37  ;;  %v830_v45 = vmul.f32 %v817_v6, %v798_v40  ;;  %v813_v48 = vpop.permute.xlu0 %812  ;;  %v801_v6 = vmax.f32 %v767_v31, 0.0 }
 0x261   :  { %1106 = vpow2.f32 %v955_v39  ;;  %v827_v52 = vmul.f32 %v813_v48, %v795_v36  ;;  %v828_v53 = vmul.f32 %v813_v48, %v796_v15  ;;  %v518_v15 = vmax.f32 %v485_v50, 0.0 }
 0x262   :  { %1108 = vpow2.f32 %v956_v41  ;;  %v981_v23 = vmul.f32 -1.442695, %v829_v44  ;;  %v982_v8 = vmul.f32 -1.442695, %v830_v45  ;;  %v802_v44 = vmax.f32 %v769_v38, 0.0 }
 0x263   :  { %v979_v46 = vmul.f32 -1.442695, %v827_v52  ;;  %v980_v13 = vmul.f32 -1.442695, %v828_v53 }
 0x264   :  { %1110 = vpow2.f32 %v981_v23  ;;  %v540_v47 = vpop.permute.xlu1 %539  ;;  %v821_v16 = vpop.permute.xlu0 %820 }
 0x265   :  { %1112 = vpow2.f32 %v982_v8  ;;  %v551_v18 = vmul.f32 %v540_v47, %v515_v10  ;;  %v552_v19 = vmul.f32 %v540_v47, %v516_v11  ;;  %v831_v21 = vmul.f32 %v821_v16, %v799_v7 }
 0x266   :  { %1114 = vpow2.f32 %v979_v46  ;;  %v832_v20 = vmul.f32 %v821_v16, %v800_v22 }
 0x267   :  { %1116 = vpow2.f32 %v980_v13  ;;  %v959_v17 = vmul.f32 -1.442695, %v551_v18  ;;  %v960_v25 = vmul.f32 -1.442695, %v552_v19  ;;  %v983_v26 = vmul.f32 -1.442695, %v831_v21 }
 0x268   :  { %v545_v33 = vpop.permute.xlu1 %544  ;;  %v984_v40 = vmul.f32 -1.442695, %v832_v20  ;;  %v825_v43 = vpop.permute.xlu0 %824 }
 0x269   :  { %v1103_v28 = vpop.eup %1102  ;;  %1118 = vpow2.f32 %v959_v17  ;;  %v553_v27 = vmul.f32 %v545_v33, %v517_v35  ;;  %v554_v12 = vmul.f32 %v545_v33, %v518_v15  ;;  %v833_v53 = vmul.f32 %v825_v43, %v801_v6 }
 0x26a   :  { %v1105_v30 = vpop.eup %1104  ;;  %v581_v32 = vadd.f32 1.0, %v1103_v28  ;;  %1120 = vpow2.f32 %v960_v25  ;;  %v834_v23 = vmul.f32 %v825_v43, %v802_v44 }
 0x26b   :  { %v1107_v34 = vpop.eup %1106  ;;  %v582_v36 = vadd.f32 1.0, %v1105_v30  ;;  %1122 = vpow2.f32 %v983_v26  ;;  %v961_v49 = vmul.f32 -1.442695, %v553_v27  ;;  %v962_v13 = vmul.f32 -1.442695, %v554_v12 }
 0x26c   :  { %v1109_v37 = vpop.eup %1108  ;;  %1124 = vrcp.f32 %v581_v32  ;;  %v579_v5 = vadd.f32 1.0, %v1107_v34  ;;  %v985_v18 = vmul.f32 -1.442695, %v833_v53  ;;  %v986_v21 = vmul.f32 -1.442695, %v834_v23  ;;  %v357_v44 = vpop.permute.xlu1 %356 }
 0x26d   :  { %1126 = vrcp.f32 %v582_v36  ;;  %v580_v14 = vadd.f32 1.0, %v1109_v37  ;;  %v1601_v23 = vadd.f32 %v1548_v56, %v357_v44 }
 0x26e   :  { %v1111_v39 = vpop.eup %1110  ;;  %1128 = vrcp.f32 %v579_v5 }
 0x26f   :  { %v1113_v41 = vpop.eup %1112  ;;  %1130 = vrcp.f32 %v580_v14  ;;  %v861_v42 = vadd.f32 1.0, %v1111_v39 }
 0x270   :  { %v1115_v51 = vpop.eup %1114  ;;  %v862_v45 = vadd.f32 1.0, %v1113_v41  ;;  %1132 = vpow2.f32 %v984_v40 }
 0x271   :  { %v1117_v48 = vpop.eup %1116  ;;  %1134 = vrcp.f32 %v861_v42  ;;  %v859_v29 = vadd.f32 1.0, %v1115_v51 }
 0x272   :  { %1136 = vrcp.f32 %v862_v45  ;;  %v860_v52 = vadd.f32 1.0, %v1117_v48 }
 0x273   :  { %v1119_v7 = vpop.eup %1118  ;;  %1138 = vrcp.f32 %v859_v29  ;;  %v367_v29 = vpop.permute.xlu1 %366 }
 0x274   :  { %v1121_v8 = vpop.eup %1120  ;;  %1140 = vrcp.f32 %v860_v52  ;;  %v583_v10 = vadd.f32 1.0, %v1119_v7  ;;  %v362_v52 = vpop.permute.xlu0 %361  ;;  %v622_v7 = vstv %s1594_s8 }
 0x275   :  { %v1123_v11 = vpop.eup %1122  ;;  %v584_v46 = vadd.f32 1.0, %v1121_v8  ;;  %1142 = vpow2.f32 %v961_v49  ;;  %v489_v49 = vadd.f32 %v1544_v54, %v357_v44  ;;  %v501_v54 = vadd.f32 %v1560_v61, %v367_v29 }
 0x276   :  { %v1125_v47 = vpop.eup %1124  ;;  %1144 = vrcp.f32 %v583_v10  ;;  %v863_v16 = vadd.f32 1.0, %v1123_v11 }
 0x277   :  { %v1127_v19 = vpop.eup %1126  ;;  %1146 = vrcp.f32 %v584_v46  ;;  %v902_v46 = vstv %s1596_s23 }
 0x278   :  { %v1129_v22 = vpop.eup %1128  ;;  %1148 = vrcp.f32 %v863_v16 }
 0x279   :  { %v1131_v24 = vpop.eup %1130  ;;  %v603_v17 = vadd.f32 %v1129_v22, %v1125_v47  ;;  %1150 = vpow2.f32 %v962_v13  ;;  %v1605_v13 = vadd.f32 %v1546_v55, %v357_v44  ;;  %v785_v55 = vadd.f32 %v1562_v62, %v367_v29 }
 0x27a   :  { %v1133_v25 = vpop.eup %1132  ;;  %v612_v26 = vadd.f32 %v1131_v24, %v1127_v19  ;;  %1152 = vpow2.f32 %v985_v18  ;;  %v1608_v18 = vadd.f32 %v1550_v57, %v357_v44  ;;  %v495_v19 = vadd.f32 %v1552_v9, %v362_v52 }
 0x27b   :  { %v1135_v20 = vpop.eup %1134  ;;  %v864_v28 = vadd.f32 1.0, %v1133_v25  ;;  %1154 = vpow2.f32 %v986_v21  ;;  %v519_v24 = vmax.f32 %v489_v49, 0.0  ;;  %v520_v25 = vmax.f32 %v1601_v23, 0.0 }
 0x27c   :  { %v1137_v30 = vpop.eup %1136  ;;  %v803_v9 = vmax.f32 %v1605_v13, 0.0  ;;  %v521_v44 = vmax.f32 %v495_v19, 0.0 }
 0x27d   :  { %v1139_v31 = vpop.eup %1138  ;;  %1156 = vrcp.f32 %v864_v28 }
 0x27e   :  { %v1141_v32 = vpop.eup %1140  ;;  %v883_v33 = vadd.f32 %v1139_v31, %v1135_v20  ;;  %v372_v20 = vpop.permute.xlu1 %371  ;;  %v1616_v31 = vadd.f32 %v1566_v0, %v367_v29 }
 0x27f   :  { %v1143_v34 = vpop.eup %1142  ;;  %v892_v35 = vadd.f32 %v1141_v32, %v1137_v30  ;;  %v804_v32 = vmax.f32 %v1608_v18, 0.0 }
 0x280   :  { %v1145_v50 = vpop.eup %1144  ;;  %v585_v36 = vadd.f32 1.0, %v1143_v34 }
 0x281   :  { %v1147_v37 = vpop.eup %1146  ;;  %v604_v38 = vadd.f32 %v1145_v50, %v603_v17 }
 0x282   :  { %v1149_v5 = vpop.eup %1148  ;;  %v613_v40 = vadd.f32 %v1147_v37, %v612_v26  ;;  %1158 = vrcp.f32 %v585_v36  ;;  %v503_v26 = vadd.f32 %v1564_v63, %v367_v29  ;;  %v507_v63 = vadd.f32 %v1568_v1, %v372_v20 }
 0x283   :  { %v1151_v14 = vpop.eup %1150  ;;  %v884_v27 = vadd.f32 %v1149_v5, %v883_v33  ;;  %v523_v33 = vmax.f32 %v501_v54, 0.0  ;;  %v807_v37 = vmax.f32 %v785_v55, 0.0 }
 0x284   :  { %v1153_v39 = vpop.eup %1152  ;;  %v586_v41 = vadd.f32 1.0, %v1151_v14  ;;  %v524_v62 = vmax.f32 %v503_v26, 0.0  ;;  %v808_v14 = vmax.f32 %v1616_v31, 0.0 }
 0x285   :  { %v1155_v15 = vpop.eup %1154  ;;  %v865_v42 = vadd.f32 1.0, %v1153_v39  ;;  %v509_v39 = vadd.f32 %v1570_v2, %v372_v20 }
 0x286   :  { %1160 = vrcp.f32 %v586_v41  ;;  %v866_v43 = vadd.f32 1.0, %v1155_v15  ;;  %v791_v41 = vadd.f32 %v1572_v3, %v372_v20  ;;  %v793_v15 = vadd.f32 %v1574_v4, %v372_v20 }
 0x287   :  { %v1157_v51 = vpop.eup %1156  ;;  %1162 = vrcp.f32 %v865_v42 }
 0x288   :  { %v893_v6 = vadd.f32 %v1157_v51, %v892_v35  ;;  %1164 = vrcp.f32 %v866_v43  ;;  %v525_v51 = vmax.f32 %v507_v63, 0.0 }
 0x28c   :  { %v1159_v45 = vpop.eup %1158 }
 0x28d   :  { %v605_v48 = vadd.f32 %v1159_v45, %v604_v38  ;;  %v497_v38 = vadd.f32 %v1556_v59, %v362_v52  ;;  %v779_v59 = vadd.f32 %v1554_v58, %v362_v52  ;;  %v781_v45 = vadd.f32 %v1558_v60, %v362_v52 }
 0x28f   :  { %v606_v12 = vrot.slane %v605_v48, 4  ;;  %v522_v13 = vmax.f32 %v497_v38, 0.0  ;;  %v805_v60 = vmax.f32 %v779_v59, 0.0  ;;  %v806_v52 = vmax.f32 %v781_v45, 0.0 }
 0x290   :  { %v1161_v53 = vpop.eup %1160 }
 0x291   :  { %v1163_v8 = vpop.eup %1162  ;;  %v607_v10 = vadd.f32 %v606_v12, %v605_v48  ;;  %v614_v11 = vadd.f32 %v1161_v53, %v613_v40  ;;  %v526_v53 = vmax.f32 %v509_v39, 0.0 }
 0x292   :  { %v1165_v47 = vpop.eup %1164  ;;  %v885_v16 = vadd.f32 %v1163_v8, %v884_v27 }
 0x293   :  { %v608_v21 = vrot.slane %v607_v10, 2  ;;  %v615_v22 = vrot.slane %v614_v11, 4  ;;  %v894_v56 = vadd.f32 %v1165_v47, %v893_v6 }
 0x294   :  { %v886_v17 = vrot.slane %v885_v16, 4 }
 0x295   :  { %v616_v28 = vadd.f32 %v615_v22, %v614_v11  ;;  %v895_v30 = vrot.slane %v894_v56, 4  ;;  %v609_v57 = vadd.f32 %v608_v21, %v607_v10  ;;  %v809_v10 = vmax.f32 %v791_v41, 0.0 }
 0x296   :  { %v887_v61 = vadd.f32 %v886_v17, %v885_v16  ;;  %v810_v11 = vmax.f32 %v793_v15, 0.0 }
 0x297   :  { %v617_v34 = vrot.slane %v616_v28, 2  ;;  %v896_v35 = vadd.f32 %v895_v30, %v894_v56  ;;  %v610_v50 = vrot.slane %v609_v57, 1 }
 0x298   :  { %v888_v36 = vrot.slane %v887_v61, 2 }
 0x299   :  { %v897_v5 = vrot.slane %v896_v35, 2  ;;  %v611_v40 = vadd.f32 %v610_v50, %v609_v57  ;;  %v618_v0 = vadd.f32 %v617_v34, %v616_v28 }
 0x29a   :  { %v889_v27 = vadd.f32 %v888_v36, %v887_v61 }
 0x29b   :  { %v619_v42 = vrot.slane %v618_v0, 1  ;;  %v623_v43 = vmul.f32 %v622_v7, %v611_v40  ;;  %v898_v1 = vadd.f32 %v897_v5, %v896_v35 }
 0x29c   :  { %v890_v6 = vrot.slane %v889_v27, 1 }
 0x29d   :  { %v620_v48 = vadd.f32 %v619_v42, %v618_v0  ;;  %v625_v29 = vmul.f32 %v623_v43, %v519_v24  ;;  %v899_v12 = vrot.slane %v898_v1, 1  ;;  %v629_v49 = vmul.f32 %v623_v43, %v523_v33 }
 0x29e   :  { %v891_v2 = vadd.f32 %v890_v6, %v889_v27  ;;  %v631_v3 = vmul.f32 %v623_v43, %v525_v51  ;;  %v627_v23 = vmul.f32 %v623_v43, %v521_v44 }
 0x29f   :  { %v624_v4 = vmul.f32 %v622_v7, %v620_v48  ;;  %633 = vst [vmem:[#allocation5] sm:$0xff] %v625_v29  ;;  %v900_v8 = vadd.f32 %v899_v12, %v898_v1  ;;  %637 = vst [vmem:[#allocation5 + $0x20] sm:$0xff] %v629_v49 }
 0x2a0   :  { %v903_v58 = vmul.f32 %v902_v46, %v891_v2  ;;  %639 = vst [vmem:[#allocation5 + $0x30] sm:$0xff] %v631_v3  ;;  %635 = vst [vmem:[#allocation5 + $0x10] sm:$0xff] %v627_v23 }
 0x2a1   :  { %v626_v47 = vmul.f32 %v624_v4, %v520_v25  ;;  %v904_v16 = vmul.f32 %v902_v46, %v900_v8  ;;  %v630_v18 = vmul.f32 %v624_v4, %v524_v62  ;;  %v632_v54 = vmul.f32 %v624_v4, %v526_v53 }
 0x2a2   :  { %v905_v7 = vmul.f32 %v903_v58, %v803_v9  ;;  %v909_v19 = vmul.f32 %v903_v58, %v807_v37  ;;  %v911_v21 = vmul.f32 %v903_v58, %v809_v10  ;;  %v628_v22 = vmul.f32 %v624_v4, %v522_v13 }
 0x2a3   :  { %634 = vst [vmem:[#allocation5 + $0x8] sm:$0xff] %v626_v47  ;;  %v906_v56 = vmul.f32 %v904_v16, %v804_v32  ;;  %638 = vst [vmem:[#allocation5 + $0x28] sm:$0xff] %v630_v18  ;;  %v910_v24 = vmul.f32 %v904_v16, %v808_v14  ;;  %v912_v17 = vmul.f32 %v904_v16, %v810_v11 }
 0x2a4   :  { %640 = vst [vmem:[#allocation5 + $0x38] sm:$0xff] %v632_v54  ;;  %v907_v26 = vmul.f32 %v903_v58, %v805_v60  ;;  %914 = vst [vmem:[#allocation5 + $0x40] sm:$0xff] %v905_v7  ;;  %v908_v25 = vmul.f32 %v904_v16, %v806_v52 }
 0x2a5   :  { %918 = vst [vmem:[#allocation5 + $0x60] sm:$0xff] %v909_v19  ;;  %920 = vst [vmem:[#allocation5 + $0x70] sm:$0xff] %v911_v21 }
 0x2a6   :  { %636 = vst [vmem:[#allocation5 + $0x18] sm:$0xff] %v628_v22  ;;  %915 = vst [vmem:[#allocation5 + $0x48] sm:$0xff] %v906_v56 }
 0x2a7   :  { %919 = vst [vmem:[#allocation5 + $0x68] sm:$0xff] %v910_v24  ;;  %921 = vst [vmem:[#allocation5 + $0x78] sm:$0xff] %v912_v17 }
 0x2a8   :  { %916 = vst [vmem:[#allocation5 + $0x50] sm:$0xff] %v907_v26  ;;  %917 = vst [vmem:[#allocation5 + $0x58] sm:$0xff] %v908_v25 }
 0x2a9   :  { %1189 = shalt.err (!%p1186_p9)
}
 0x2aa   :  { %s1190_s27 = scalar_lea.hbm %s1653_s9, 2048 }
 0x2ab   :  { %p1191_p10 = scmp.ne.s32.totalorder %s1653_s9, %s1190_s27  ;;  %p1194_p11 = scmp.lt.u32.totalorder %s1190_s27, %s1653_s9 }
 0x2ad   :  { %p1196_p12 = pnand %p1194_p11, %p1191_p10 }
 0x2af   :  { %1199 = shalt.err (!%p1196_p12)
}
 0x2b0   :  { %s1209_s10 = smov 256   ;;  %s1210_s11 = smov 16  }
 0x2b1   :  { %933 = dma.vmem_to_hbm [thread:$0]  %s928_s24, 2048, %s1653_s9, [#allocation3], %s1209_s10, %s1209_s10, %s1210_s11  }
 0x2b2   :  { %1202 = dma.done.wait [#allocation3], 2048  }
 0x2b3   :  { %1203 = vsyncadd [#allocation3], 4294965248 }
 0x2b4   :  { %937 = vsyncpa [#allocation3], 1 }
 0x2b5   :  { %938 = vsyncpa [#allocation4], 1 }

</bundles_post_ra>
